<compile_context>
chip_gen: v7x
topology: tpu7x:2x2x1
jax: 0.10.0
libtpu: 0.0.40
codegen_flags: <defaults>
</compile_context>

<pallas_src>
import functools
import math

import numpy as np

import jax
import jax.numpy as jnp
from jax.experimental import pallas as pl
from jax.experimental.pallas import tpu as pltpu


_NUM_LAYERS = 3
_HIDDEN = 16


def _round_up(x, m):
    return -(-x // m) * m


def _layer_dims(cin, h, w):
    """Static per-layer geometry + packed-G row offsets (batch independent)."""
    dims = []
    c_in, h_in, w_in = cin, h, w
    g_off = 0
    for _ in range(_NUM_LAYERS):
        assert h_in % 2 == 0 and w_in % 2 == 0, (
            "this k=3/s=2/p=1 layout assumes even spatial dims per layer")
        c_out, h_out, w_out = _HIDDEN, h_in // 2, w_in // 2
        d = dict(c_in=c_in, h_in=h_in, w_in=w_in,
                 c_out=c_out, h_out=h_out, w_out=w_out,
                 k_rows=w_in * c_in,      # contraction dim of the G matmul
                 n_cols=w_out * c_out,    # output columns (ow, co)
                 g_off=g_off)             # first gpack row of G_{l, kh=0}
        dims.append(d)
        g_off += 3 * d['k_rows']
        c_in, h_in, w_in = c_out, h_out, w_out
    return dims


# ----------------------------------------------------------------------------
# One-time parameter preprocessing (outside the steady-state forward path).
# ----------------------------------------------------------------------------
def _col_sel(w_in, w_out, kw):
    """sel[w, ow] = 1 iff w == 2*ow + kw - 1 (horizontal gather + zero pad)."""
    s = np.zeros((w_in, w_out), np.float32)
    for ow in range(w_out):
        w = 2 * ow + kw - 1
        if 0 <= w < w_in:
            s[w, ow] = 1.0
    return s


def prepare_params(params, cin, height, width):
    """Fold PyTorch-layout conv params into two packed operand buffers.

    params: list of (weight (Cout, Cin, 3, 3), bias (Cout,)) per conv layer.
    Returns:
      gpack (bf16, (R, 128)): all 9 folded operators G_{l,kh}, row-stacked,
                              lane-padded to 128.
      bpack (f32,  (8, 128)): one bias row per layer, lane-padded to 128.
    """
    dims = _layer_dims(cin, height, width)
    total_rows = _round_up(dims[-1]['g_off'] + 3 * dims[-1]['k_rows'], 8)
    gpack = np.zeros((total_rows, 128), np.float32)
    bpack = np.zeros((8, 128), np.float32)
    for layer, ((w_oihw, b), d) in enumerate(zip(params, dims)):
        w_np = np.asarray(w_oihw, np.float32)
        b_np = np.asarray(b, np.float32)
        for kh in range(3):
            g = np.zeros((d['k_rows'], d['n_cols']), np.float32)
            for kw in range(3):
                # G_kh[(w,ci),(ow,co)] = [w == 2*ow+kw-1] * W[co,ci,kh,kw]
                g += np.kron(_col_sel(d['w_in'], d['w_out'], kw),
                             w_np[:, :, kh, kw].T)
            r0 = d['g_off'] + kh * d['k_rows']
            gpack[r0:r0 + d['k_rows'], :d['n_cols']] = g
        bpack[layer, :d['n_cols']] = np.tile(b_np, d['w_out'])
    return (jnp.asarray(gpack, dtype=jnp.bfloat16),
            jnp.asarray(bpack, dtype=jnp.float32))


# ----------------------------------------------------------------------------
# Pallas kernel: fused 3-layer conv encoder; intermediates never leave VMEM.
# ----------------------------------------------------------------------------
def _encoder_kernel(x_ref, g_ref, b_ref, o_ref, s1_ref, s2_ref, *,
                    dims, n_batch):
    def conv_relu(src_ref, layer, d):
        m = n_batch * d['h_out']                 # output rows (n, oh)
        acc = None
        for kh in range(3):                      # static unroll: 3 vertical taps
            tap = src_ref[pl.ds(kh, m, stride=2), :].astype(jnp.bfloat16)
            r0 = d['g_off'] + kh * d['k_rows']
            g = g_ref[r0:r0 + d['k_rows'], 0:d['n_cols']]
            t = jnp.dot(tap, g, preferred_element_type=jnp.float32)
            if kh == 0:
                # kh=0 at output rows (n, oh=0) must see the vertical zero pad;
                # for n >= 1 the strided load picked up sample n-1's last row,
                # so zero those rows of this term.
                rows = jax.lax.broadcasted_iota(jnp.int32, t.shape, 0)
                halo = rows == 0
                for nb in range(1, n_batch):
                    halo = jnp.logical_or(halo, rows == nb * d['h_out'])
                t = jnp.where(halo, 0.0, t)
            acc = t if acc is None else acc + t
        bias = b_ref[layer:layer + 1, 0:d['n_cols']]
        return jnp.maximum(acc + bias, 0.0)

    d1, d2, d3 = dims

    # Zero the halo rows of the two staging scratches (single invocation).
    s1_ref[0:1, :] = jnp.zeros((1, d1['n_cols']), jnp.float32)
    s2_ref[0:1, :] = jnp.zeros((1, d2['n_cols']), jnp.float32)

    a1 = conv_relu(x_ref, 0, d1)                         # (N*H/2, (W/2)*16)
    s1_ref[1:1 + n_batch * d1['h_out'], :] = a1
    a2 = conv_relu(s1_ref, 1, d2)                        # (N*H/4, (W/4)*16)
    s2_ref[1:1 + n_batch * d2['h_out'], :] = a2
    a3 = conv_relu(s2_ref, 2, d3)                        # (N*H/8, (W/8)*16)
    o_ref[...] = a3.astype(o_ref.dtype)


# ----------------------------------------------------------------------------
# Forward pass: one pallas_call + one-off layout glue at the boundaries.
# ----------------------------------------------------------------------------
def cnn_encoder_forward(x_nchw, gpack, bpack):
    n, cin, h, w = x_nchw.shape
    dims = _layer_dims(cin, h, w)
    d3 = dims[2]

    # Pack NCHW input into rows=(n,h), cols=(w,c) with one zero halo row on
    # top; rows padded to a sublane multiple.
    x2d = jnp.transpose(x_nchw, (0, 2, 3, 1)).reshape(n * h, w * cin)
    rows_pad = _round_up(1 + n * h, 8)
    xpad = jnp.pad(x2d.astype(jnp.float32),
                   ((1, rows_pad - 1 - n * h), (0, 0)))

    out_rows = n * d3['h_out']
    out_cols = d3['n_cols']
    vmem = lambda: pl.BlockSpec(memory_space=pltpu.MemorySpace.VMEM)

    kernel = functools.partial(_encoder_kernel, dims=dims, n_batch=n)
    # NOTE: at realistic batch sizes, add a leading batch-tile grid axis with
    # compiler_params=pltpu.CompilerParams(dimension_semantics=("parallel",))
    # so v7x's second TensorCore is used; at N=2 a grid only adds overhead.
    out2d = pl.pallas_call(
        kernel,
        out_shape=jax.ShapeDtypeStruct((out_rows, out_cols), jnp.float32),
        in_specs=[vmem(), vmem(), vmem()],
        out_specs=vmem(),
        scratch_shapes=[
            pltpu.VMEM((1 + n * dims[0]['h_out'], dims[0]['n_cols']),
                       jnp.float32),
            pltpu.VMEM((1 + n * dims[1]['h_out'], dims[1]['n_cols']),
                       jnp.float32),
        ],
    )(xpad, gpack, bpack)

    # torch.nn.Flatten order: (N, C, OH, OW) -> (N, C*OH*OW).  Tiny one-off
    # permutation of the (N*OH, OW*C) kernel result, done in XLA.
    oh, ow, c = d3['h_out'], d3['w_out'], d3['c_out']
    y = out2d.reshape(n, oh, ow, c).transpose(0, 3, 1, 2).reshape(n, -1)
    return y


# ----------------------------------------------------------------------------
# Init / reference / driver.
# ----------------------------------------------------------------------------
def init_conv_params(key, cin, cout, k=3):
    """PyTorch Conv2d default init (uniform +-1/sqrt(fan_in))."""
    wkey, bkey = jax.random.split(key)
    fan_in = cin * k * k
    bound = math.sqrt(1.0 / fan_in)
    w = jax.random.uniform(wkey, (cout, cin, k, k), jnp.float32, -bound, bound)
    b = jax.random.uniform(bkey, (cout,), jnp.float32, -bound, bound)
    return w, b


def reference_forward(x, params):
    """Pure-XLA f32 reference matching the PyTorch CNNEncoder forward."""
    for w, b in params:
        x = jax.lax.conv_general_dilated(
            x, w, window_strides=(2, 2), padding=((1, 1), (1, 1)),
            dimension_numbers=("NCHW", "OIHW", "NCHW"),
            precision=jax.lax.Precision.HIGHEST)
        x = jnp.maximum(x + b.reshape(1, -1, 1, 1), 0.0)
    return x.reshape(x.shape[0], -1)


if __name__ == "__main__":
    key = jax.random.PRNGKey(0)
    kx, k1, k2, k3 = jax.random.split(key, 4)

    N, Cin, H, W = 2, 4, 16, 16
    x = jax.random.normal(kx, (N, Cin, H, W), dtype=jnp.float32)

    params = [
        init_conv_params(k1, Cin, 16),   # Conv2d(Cin, 16, 3, 2, 1)
        init_conv_params(k2, 16, 16),    # Conv2d(16, 16, 3, 2, 1)
        init_conv_params(k3, 16, 16),    # Conv2d(16, 16, 3, 2, 1)
    ]

    # One-time weight preprocessing (batch independent).
    gpack, bpack = prepare_params(params, Cin, H, W)

    fwd = jax.jit(cnn_encoder_forward)
    out = jax.block_until_ready(fwd(x, gpack, bpack))

    expected_shape = (N, 16 * (H // 8) * (W // 8))   # (2, 64)
    assert out.shape == expected_shape, f"got {out.shape}, expected {expected_shape}"

    ref = jax.block_until_ready(reference_forward(x, params))
    max_err = float(jnp.max(jnp.abs(out - ref)))
    # bf16 MXU operands (per performance review) vs. an f32 HIGHEST reference:
    # tolerance relaxed to 2e-2 accordingly.
    assert jnp.allclose(out, ref, atol=2e-2, rtol=2e-2), f"max abs err {max_err}"

    print("KERNEL_OK")
</pallas_src>

<mosaic_0001>
module attributes {stable_mosaic.version = 11 : i64} {
  func.func @_encoder_kernel(%arg0: memref<40x64xf32, #tpu.memory_space<vmem>>, %arg1: memref<768x128xbf16, #tpu.memory_space<vmem>>, %arg2: memref<8x128xf32, #tpu.memory_space<vmem>>, %arg3: memref<4x32xf32, #tpu.memory_space<vmem>>, %arg4: memref<17x128xf32, #tpu.memory_space<vmem>>, %arg5: memref<9x64xf32, #tpu.memory_space<vmem>>) attributes {dimension_semantics = [], scalar_prefetch = 0 : i64, scratch_operands = 2 : i64, tpu.core_type = #tpu.core_type<tc>} {
    %cst = arith.constant 0.000000e+00 : f32
    %0 = vector.broadcast %cst : f32 to vector<1x128xf32>
    %c0 = arith.constant 0 : index
    %c0_0 = arith.constant 0 : index
    %1 = vector.load %arg4[%c0, %c0_0] : memref<17x128xf32, #tpu.memory_space<vmem>>, vector<1x128xf32>
    tpu.vector_store %arg4[%c0, %c0_0], %0 {strides = array<i32>} : memref<17x128xf32, #tpu.memory_space<vmem>>, vector<1x128xf32>,
    %cst_1 = arith.constant 0.000000e+00 : f32
    %2 = vector.broadcast %cst_1 : f32 to vector<1x64xf32>
    %c0_2 = arith.constant 0 : index
    %c0_3 = arith.constant 0 : index
    %3 = vector.load %arg5[%c0_2, %c0_3] : memref<9x64xf32, #tpu.memory_space<vmem>>, vector<1x64xf32>
    tpu.vector_store %arg5[%c0_2, %c0_3], %2 {strides = array<i32>} : memref<9x64xf32, #tpu.memory_space<vmem>>, vector<1x64xf32>,
    %c0_4 = arith.constant 0 : index
    %c0_5 = arith.constant 0 : index
    %4 = tpu.strided_load %arg0[%c0_4, %c0_5] {strides = array<i32: 2, 1>} : memref<40x64xf32, #tpu.memory_space<vmem>>, vector<16x64xf32>
    %5 = arith.truncf %4 : vector<16x64xf32> to vector<16x64xbf16>
    %c0_6 = arith.constant 0 : index
    %c0_7 = arith.constant 0 : index
    %6 = vector.load %arg1[%c0_6, %c0_7] : memref<768x128xbf16, #tpu.memory_space<vmem>>, vector<64x128xbf16>
    %cst_8 = arith.constant dense<0.000000e+00> : vector<16x128xf32>
    %7 = tpu.matmul %5, %6, %cst_8 {dimension_numbers = #tpu.dot_dimension_numbers<[1], [0], [0], [1], [0, 0, 1, 1], [], []>} : vector<16x64xbf16>, vector<64x128xbf16>, vector<16x128xf32> -> vector<16x128xf32>
    %8 = tpu.iota {dimensions = array<i32: 0>} : vector<16x128xi32>
    %c0_i32 = arith.constant 0 : i32
    %9 = vector.broadcast %c0_i32 : i32 to vector<16x128xi32>
    %10 = arith.cmpi eq, %8, %9 : vector<16x128xi32>
    %c8_i32 = arith.constant 8 : i32
    %11 = vector.broadcast %c8_i32 : i32 to vector<16x128xi32>
    %12 = arith.cmpi eq, %8, %11 : vector<16x128xi32>
    %13 = arith.ori %10, %12 : vector<16x128xi1>
    %cst_9 = arith.constant 0.000000e+00 : f32
    %14 = vector.broadcast %cst_9 : f32 to vector<16x128xf32>
    %15 = arith.select %13, %14, %7 : vector<16x128xi1>, vector<16x128xf32>
    %c1 = arith.constant 1 : index
    %c0_10 = arith.constant 0 : index
    %16 = tpu.strided_load %arg0[%c1, %c0_10] {strides = array<i32: 2, 1>} : memref<40x64xf32, #tpu.memory_space<vmem>>, vector<16x64xf32>
    %17 = arith.truncf %16 : vector<16x64xf32> to vector<16x64xbf16>
    %c64 = arith.constant 64 : index
    %c0_11 = arith.constant 0 : index
    %18 = vector.load %arg1[%c64, %c0_11] : memref<768x128xbf16, #tpu.memory_space<vmem>>, vector<64x128xbf16>
    %cst_12 = arith.constant dense<0.000000e+00> : vector<16x128xf32>
    %19 = tpu.matmul %17, %18, %cst_12 {dimension_numbers = #tpu.dot_dimension_numbers<[1], [0], [0], [1], [0, 0, 1, 1], [], []>} : vector<16x64xbf16>, vector<64x128xbf16>, vector<16x128xf32> -> vector<16x128xf32>
    %20 = arith.addf %15, %19 : vector<16x128xf32>
    %c2 = arith.constant 2 : index
    %c0_13 = arith.constant 0 : index
    %21 = tpu.strided_load %arg0[%c2, %c0_13] {strides = array<i32: 2, 1>} : memref<40x64xf32, #tpu.memory_space<vmem>>, vector<16x64xf32>
    %22 = arith.truncf %21 : vector<16x64xf32> to vector<16x64xbf16>
    %c128 = arith.constant 128 : index
    %c0_14 = arith.constant 0 : index
    %23 = vector.load %arg1[%c128, %c0_14] : memref<768x128xbf16, #tpu.memory_space<vmem>>, vector<64x128xbf16>
    %cst_15 = arith.constant dense<0.000000e+00> : vector<16x128xf32>
    %24 = tpu.matmul %22, %23, %cst_15 {dimension_numbers = #tpu.dot_dimension_numbers<[1], [0], [0], [1], [0, 0, 1, 1], [], []>} : vector<16x64xbf16>, vector<64x128xbf16>, vector<16x128xf32> -> vector<16x128xf32>
    %25 = arith.addf %20, %24 : vector<16x128xf32>
    %c0_16 = arith.constant 0 : index
    %c0_17 = arith.constant 0 : index
    %26 = vector.load %arg2[%c0_16, %c0_17] : memref<8x128xf32, #tpu.memory_space<vmem>>, vector<1x128xf32>
    %27 = vector.broadcast %26 : vector<1x128xf32> to vector<16x128xf32>
    %28 = arith.addf %25, %27 : vector<16x128xf32>
    %cst_18 = arith.constant 0.000000e+00 : f32
    %29 = vector.broadcast %cst_18 : f32 to vector<16x128xf32>
    %30 = arith.maximumf %28, %29 : vector<16x128xf32>
    %c1_19 = arith.constant 1 : index
    %c0_20 = arith.constant 0 : index
    %31 = vector.load %arg4[%c1_19, %c0_20] : memref<17x128xf32, #tpu.memory_space<vmem>>, vector<16x128xf32>
    tpu.vector_store %arg4[%c1_19, %c0_20], %30 {strides = array<i32>} : memref<17x128xf32, #tpu.memory_space<vmem>>, vector<16x128xf32>,
    %c0_21 = arith.constant 0 : index
    %c0_22 = arith.constant 0 : index
    %32 = tpu.strided_load %arg4[%c0_21, %c0_22] {strides = array<i32: 2, 1>} : memref<17x128xf32, #tpu.memory_space<vmem>>, vector<8x128xf32>
    %33 = arith.truncf %32 : vector<8x128xf32> to vector<8x128xbf16>
    %c192 = arith.constant 192 : index
    %c0_23 = arith.constant 0 : index
    %34 = vector.load %arg1[%c192, %c0_23] : memref<768x128xbf16, #tpu.memory_space<vmem>>, vector<128x64xbf16>
    %cst_24 = arith.constant dense<0.000000e+00> : vector<8x64xf32>
    %35 = tpu.matmul %33, %34, %cst_24 {dimension_numbers = #tpu.dot_dimension_numbers<[1], [0], [0], [1], [0, 0, 1, 1], [], []>} : vector<8x128xbf16>, vector<128x64xbf16>, vector<8x64xf32> -> vector<8x64xf32>
    %36 = tpu.iota {dimensions = array<i32: 0>} : vector<8x64xi32>
    %c0_i32_25 = arith.constant 0 : i32
    %37 = vector.broadcast %c0_i32_25 : i32 to vector<8x64xi32>
    %38 = arith.cmpi eq, %36, %37 : vector<8x64xi32>
    %c4_i32 = arith.constant 4 : i32
    %39 = vector.broadcast %c4_i32 : i32 to vector<8x64xi32>
    %40 = arith.cmpi eq, %36, %39 : vector<8x64xi32>
    %41 = arith.ori %38, %40 : vector<8x64xi1>
    %cst_26 = arith.constant 0.000000e+00 : f32
    %42 = vector.broadcast %cst_26 : f32 to vector<8x64xf32>
    %43 = arith.select %41, %42, %35 : vector<8x64xi1>, vector<8x64xf32>
    %c1_27 = arith.constant 1 : index
    %c0_28 = arith.constant 0 : index
    %44 = tpu.strided_load %arg4[%c1_27, %c0_28] {strides = array<i32: 2, 1>} : memref<17x128xf32, #tpu.memory_space<vmem>>, vector<8x128xf32>
    %45 = arith.truncf %44 : vector<8x128xf32> to vector<8x128xbf16>
    %c320 = arith.constant 320 : index
    %c0_29 = arith.constant 0 : index
    %46 = vector.load %arg1[%c320, %c0_29] : memref<768x128xbf16, #tpu.memory_space<vmem>>, vector<128x64xbf16>
    %cst_30 = arith.constant dense<0.000000e+00> : vector<8x64xf32>
    %47 = tpu.matmul %45, %46, %cst_30 {dimension_numbers = #tpu.dot_dimension_numbers<[1], [0], [0], [1], [0, 0, 1, 1], [], []>} : vector<8x128xbf16>, vector<128x64xbf16>, vector<8x64xf32> -> vector<8x64xf32>
    %48 = arith.addf %43, %47 : vector<8x64xf32>
    %c2_31 = arith.constant 2 : index
    %c0_32 = arith.constant 0 : index
    %49 = tpu.strided_load %arg4[%c2_31, %c0_32] {strides = array<i32: 2, 1>} : memref<17x128xf32, #tpu.memory_space<vmem>>, vector<8x128xf32>
    %50 = arith.truncf %49 : vector<8x128xf32> to vector<8x128xbf16>
    %c448 = arith.constant 448 : index
    %c0_33 = arith.constant 0 : index
    %51 = vector.load %arg1[%c448, %c0_33] : memref<768x128xbf16, #tpu.memory_space<vmem>>, vector<128x64xbf16>
    %cst_34 = arith.constant dense<0.000000e+00> : vector<8x64xf32>
    %52 = tpu.matmul %50, %51, %cst_34 {dimension_numbers = #tpu.dot_dimension_numbers<[1], [0], [0], [1], [0, 0, 1, 1], [], []>} : vector<8x128xbf16>, vector<128x64xbf16>, vector<8x64xf32> -> vector<8x64xf32>
    %53 = arith.addf %48, %52 : vector<8x64xf32>
    %c1_35 = arith.constant 1 : index
    %c0_36 = arith.constant 0 : index
    %54 = vector.load %arg2[%c1_35, %c0_36] : memref<8x128xf32, #tpu.memory_space<vmem>>, vector<1x64xf32>
    %55 = vector.broadcast %54 : vector<1x64xf32> to vector<8x64xf32>
    %56 = arith.addf %53, %55 : vector<8x64xf32>
    %cst_37 = arith.constant 0.000000e+00 : f32
    %57 = vector.broadcast %cst_37 : f32 to vector<8x64xf32>
    %58 = arith.maximumf %56, %57 : vector<8x64xf32>
    %c1_38 = arith.constant 1 : index
    %c0_39 = arith.constant 0 : index
    %59 = vector.load %arg5[%c1_38, %c0_39] : memref<9x64xf32, #tpu.memory_space<vmem>>, vector<8x64xf32>
    tpu.vector_store %arg5[%c1_38, %c0_39], %58 {strides = array<i32>} : memref<9x64xf32, #tpu.memory_space<vmem>>, vector<8x64xf32>,
    %c0_40 = arith.constant 0 : index
    %c0_41 = arith.constant 0 : index
    %60 = tpu.strided_load %arg5[%c0_40, %c0_41] {strides = array<i32: 2, 1>} : memref<9x64xf32, #tpu.memory_space<vmem>>, vector<4x64xf32>
    %61 = arith.truncf %60 : vector<4x64xf32> to vector<4x64xbf16>
    %c576 = arith.constant 576 : index
    %c0_42 = arith.constant 0 : index
    %62 = vector.load %arg1[%c576, %c0_42] : memref<768x128xbf16, #tpu.memory_space<vmem>>, vector<64x32xbf16>
    %cst_43 = arith.constant dense<0.000000e+00> : vector<4x32xf32>
    %63 = tpu.matmul %61, %62, %cst_43 {dimension_numbers = #tpu.dot_dimension_numbers<[1], [0], [0], [1], [0, 0, 1, 1], [], []>} : vector<4x64xbf16>, vector<64x32xbf16>, vector<4x32xf32> -> vector<4x32xf32>
    %64 = tpu.iota {dimensions = array<i32: 0>} : vector<4x32xi32>
    %c0_i32_44 = arith.constant 0 : i32
    %65 = vector.broadcast %c0_i32_44 : i32 to vector<4x32xi32>
    %66 = arith.cmpi eq, %64, %65 : vector<4x32xi32>
    %c2_i32 = arith.constant 2 : i32
    %67 = vector.broadcast %c2_i32 : i32 to vector<4x32xi32>
    %68 = arith.cmpi eq, %64, %67 : vector<4x32xi32>
    %69 = arith.ori %66, %68 : vector<4x32xi1>
    %cst_45 = arith.constant 0.000000e+00 : f32
    %70 = vector.broadcast %cst_45 : f32 to vector<4x32xf32>
    %71 = arith.select %69, %70, %63 : vector<4x32xi1>, vector<4x32xf32>
    %c1_46 = arith.constant 1 : index
    %c0_47 = arith.constant 0 : index
    %72 = tpu.strided_load %arg5[%c1_46, %c0_47] {strides = array<i32: 2, 1>} : memref<9x64xf32, #tpu.memory_space<vmem>>, vector<4x64xf32>
    %73 = arith.truncf %72 : vector<4x64xf32> to vector<4x64xbf16>
    %c640 = arith.constant 640 : index
    %c0_48 = arith.constant 0 : index
    %74 = vector.load %arg1[%c640, %c0_48] : memref<768x128xbf16, #tpu.memory_space<vmem>>, vector<64x32xbf16>
    %cst_49 = arith.constant dense<0.000000e+00> : vector<4x32xf32>
    %75 = tpu.matmul %73, %74, %cst_49 {dimension_numbers = #tpu.dot_dimension_numbers<[1], [0], [0], [1], [0, 0, 1, 1], [], []>} : vector<4x64xbf16>, vector<64x32xbf16>, vector<4x32xf32> -> vector<4x32xf32>
    %76 = arith.addf %71, %75 : vector<4x32xf32>
    %c2_50 = arith.constant 2 : index
    %c0_51 = arith.constant 0 : index
    %77 = tpu.strided_load %arg5[%c2_50, %c0_51] {strides = array<i32: 2, 1>} : memref<9x64xf32, #tpu.memory_space<vmem>>, vector<4x64xf32>
    %78 = arith.truncf %77 : vector<4x64xf32> to vector<4x64xbf16>
    %c704 = arith.constant 704 : index
    %c0_52 = arith.constant 0 : index
    %79 = vector.load %arg1[%c704, %c0_52] : memref<768x128xbf16, #tpu.memory_space<vmem>>, vector<64x32xbf16>
    %cst_53 = arith.constant dense<0.000000e+00> : vector<4x32xf32>
    %80 = tpu.matmul %78, %79, %cst_53 {dimension_numbers = #tpu.dot_dimension_numbers<[1], [0], [0], [1], [0, 0, 1, 1], [], []>} : vector<4x64xbf16>, vector<64x32xbf16>, vector<4x32xf32> -> vector<4x32xf32>
    %81 = arith.addf %76, %80 : vector<4x32xf32>
    %c2_54 = arith.constant 2 : index
    %c0_55 = arith.constant 0 : index
    %82 = vector.load %arg2[%c2_54, %c0_55] : memref<8x128xf32, #tpu.memory_space<vmem>>, vector<1x32xf32>
    %83 = vector.broadcast %82 : vector<1x32xf32> to vector<4x32xf32>
    %84 = arith.addf %81, %83 : vector<4x32xf32>
    %cst_56 = arith.constant 0.000000e+00 : f32
    %85 = vector.broadcast %cst_56 : f32 to vector<4x32xf32>
    %86 = arith.maximumf %84, %85 : vector<4x32xf32>
    %c0_57 = arith.constant 0 : index
    %c0_58 = arith.constant 0 : index
    %87 = vector.load %arg3[%c0_57, %c0_58] : memref<4x32xf32, #tpu.memory_space<vmem>>, vector<4x32xf32>
    tpu.vector_store %arg3[%c0_57, %c0_58], %86 {strides = array<i32>} : memref<4x32xf32, #tpu.memory_space<vmem>>, vector<4x32xf32>,
    return
  }
}

</mosaic_0001>

<bundles_post_ra>
// kernel: cnn_encoder_forward.1
= control target key start
LH: loop header
LB: loop body
LE: loop exit
PB: predicated region body
PF: predicated region fallthrough
CT: control target
= control target key end

     0   :  { %v1172_v0 = vmov 0.0   ;;  %vm1173_vm0 = vmmov 0   ;;  %vm54_vm1 = vcmask 523264   ;;  %v99_v38 = vlaneseq  ;;  %s1455_s1 = inlined_call_operand.vmem [shape: bf16[768,128], index: 1, kind: input, shape index: {}]   ;;  %s1456_s0 = inlined_call_operand.vmem [shape: f32[40,64], index: 0, kind: input, shape index: {}]   ;;  %s1457_s2 = inlined_call_operand.vmem [shape: f32[8,128], index: 2, kind: input, shape index: {}]   ;;  %s1458_s3 = inlined_call_operand.vmem [shape: f32[4,32], index: 3, kind: output, shape index: {}]  }
   0x1   :  { %990 = vmatprep.subr.bf16.mxu0 %v1172_v0  ;;  %15 = vst [vmem:[#allocation2] sm:$0x1] %v1172_v0  ;;  %v1124_v1 = vld [vmem:[%s1455_s1] sm:$0xff]   ;;  %1002 = vmatprep.subr.bf16.mxu1 %v1172_v0  ;;  %v1126_v3 = vld [vmem:[%s1455_s1 + $0x8] sm:$0xff]   ;;  %v1128_v5 = vld [vmem:[%s1455_s1 + $0x10] sm:$0xff]   ;;  %vm16_vm4 = vcmask 516096  }
   0x2   :  { %v1125_v2 = vld [vmem:[%s1455_s1 + $0x20] sm:$0xff]   ;;  %998 = vmatprep.mubr.msk.bf16.mxu0 %vm1173_vm0, %v1172_v0  ;;  %1010 = vmatprep.mubr.msk.bf16.mxu1 %vm1173_vm0, %v1172_v0  ;;  %v1127_v4 = vld [vmem:[%s1455_s1 + $0x28] sm:$0xff]   ;;  %v1129_v6 = vld [vmem:[%s1455_s1 + $0x30] sm:$0xff]   ;;  %v1340_v39 = vshrl.u32 %v99_v38, 7  ;;  %17 = vst.msk [vmem:[#allocation3] sm:$0x1] %vm16_vm4, %v1172_v0 }
   0x3   :  { %991 = vmatpush3.bf16.msra.mxu0 %v1124_v1  ;;  %1003 = vmatpush3.bf16.msra.mxu1 %v1125_v2  ;;  %v1130_v7 = vld [vmem:[%s1455_s1 + $0x18] sm:$0xff]   ;;  %v18_v8 = vld [vmem:[%s1456_s0] ss:$2 sm:$0xff]  ;;  %v877_v11 = vld [vmem:[%s1456_s0 + $0x1] ss:$2 sm:$0xff]  ;;  %vm865_vm9 = vcmask 257024  }
   0x4   :  { %992 = vmatprep.subr.bf16.mxu0 %v1172_v0  ;;  %1004 = vmatprep.subr.bf16.mxu1 %v1172_v0  ;;  %v1131_v9 = vld [vmem:[%s1455_s1 + $0x38] sm:$0xff]   ;;  %v1132_v14 = vld [vmem:[%s1455_s1 + $0x40] sm:$0xff]   ;;  %v1133_v16 = vld [vmem:[%s1455_s1 + $0x48] sm:$0xff]   ;;  %v101_v40 = vadd.s32 8, %v1340_v39  ;;  %vm102_vm2 = vcmp.eq.s32.totalorder %v1340_v39, 0  ;;  %vm393_vm5 = vcmp.eq.s32.totalorder %v1340_v39, 4 }
   0x5   :  { %v871_v10 = vld [vmem:[%s1456_s0 + $0x10] ss:$2 sm:$0xff]  ;;  %v878_v12 = vld [vmem:[%s1456_s0 + $0x11] ss:$2 sm:$0xff]  ;;  %v1136_v22 = vld [vmem:[%s1455_s1 + $0x60] sm:$0xff]   ;;  %vm697_vm7 = vcmp.eq.s32.totalorder %v1340_v39, 2 }
   0x6   :  { %v21_v13 = vpack.c.bf16 %v871_v10, %v18_v8  ;;  %v114_v15 = vpack.c.bf16 %v878_v12, %v877_v11  ;;  %v1134_v17 = vld [vmem:[%s1455_s1 + $0x50] sm:$0xff]   ;;  %v1135_v18 = vld [vmem:[%s1455_s1 + $0x58] sm:$0xff]   ;;  %v1137_v23 = vld [vmem:[%s1455_s1 + $0xa0] sm:$0xff]   ;;  %vm105_vm3 = vcmp.eq.s32.totalorder %v101_v40, 8 }
   0x7   :  { %993 = vmatpush3.bf16.msra.mxu0 %v1126_v3  ;;  %1005 = vmatpush3.bf16.msra.mxu1 %v1127_v4  ;;  %v884_v19 = vld [vmem:[%s1456_s0 + $0x2] ss:$2 sm:$0xff]  ;;  %v885_v20 = vld [vmem:[%s1456_s0 + $0x12] ss:$2 sm:$0xff]  ;;  %vm394_vm6 = vmor %vm102_vm2, %vm393_vm5 }
   0x8   :  { %994 = vmatprep.subr.bf16.mxu0 %v1172_v0  ;;  %1006 = vmatprep.subr.bf16.mxu1 %v1172_v0  ;;  %v197_v21 = vpack.c.bf16 %v885_v20, %v884_v19  ;;  %v1138_v24 = vld [vmem:[%s1455_s1 + $0x68] sm:$0xff]   ;;  %v1140_v26 = vld [vmem:[%s1455_s1 + $0x70] sm:$0xff]   ;;  %v1142_v28 = vld [vmem:[%s1455_s1 + $0x78] sm:$0xff]  }
   0x9   :  { %v1139_v25 = vld [vmem:[%s1455_s1 + $0xa8] sm:$0xff]   ;;  %v1141_v27 = vld [vmem:[%s1455_s1 + $0xb0] sm:$0xff]   ;;  %v1143_v29 = vld [vmem:[%s1455_s1 + $0xb8] sm:$0xff]  }
   0xa   :  { %v1144_v30 = vld [vmem:[%s1455_s1 + $0x80] sm:$0xff]   ;;  %v1146_v32 = vld [vmem:[%s1455_s1 + $0x88] sm:$0xff]   ;;  %v1148_v34 = vld [vmem:[%s1455_s1 + $0x90] sm:$0xff]  }
   0xb   :  { %995 = vmatpush3.bf16.msra.mxu0 %v1128_v5  ;;  %1007 = vmatpush3.bf16.msra.mxu1 %v1129_v6  ;;  %v1145_v31 = vld [vmem:[%s1455_s1 + $0xc0] sm:$0xff]   ;;  %v1147_v33 = vld [vmem:[%s1455_s1 + $0xc8] sm:$0xff]   ;;  %v1149_v35 = vld [vmem:[%s1455_s1 + $0xd0] sm:$0xff]  }
   0xc   :  { %996 = vmatprep.subr.bf16.mxu0 %v1172_v0  ;;  %1008 = vmatprep.subr.bf16.mxu1 %v1172_v0  ;;  %v1150_v36 = vld [vmem:[%s1455_s1 + $0x98] sm:$0xff]   ;;  %v891_v54 = vld [vmem:[%s1457_s2] ss:$0 sm:$0xff]  ;;  %v1153_v6 = vld [vmem:[%s1455_s1 + $0xe8] sm:$0xff]  }
   0xd   :  { %v1151_v37 = vld [vmem:[%s1455_s1 + $0xd8] sm:$0xff]   ;;  %v1152_v3 = vld [vmem:[%s1455_s1 + $0xe0] sm:$0xff]   ;;  %v1157_v10 = vld [vmem:[%s1455_s1 + $0x108] sm:$0xff]  }
   0xe   :  { %v1155_v8 = vld [vmem:[%s1455_s1 + $0xf8] sm:$0xff]   ;;  %v1158_v11 = vld [vmem:[%s1455_s1 + $0x110] sm:$0xff]   ;;  %vm698_vm8 = vmor %vm102_vm2, %vm697_vm7 }
   0xf   :  { %997 = vmatpush3.bf16.msra.mxu0 %v1130_v7  ;;  %1009 = vmatpush3.bf16.msra.mxu1 %v1131_v9  ;;  %v1154_v7 = vld [vmem:[%s1455_s1 + $0xf0] sm:$0xff]   ;;  %v1156_v9 = vld [vmem:[%s1455_s1 + $0x100] sm:$0xff]   ;;  %v1159_v12 = vld [vmem:[%s1455_s1 + $0x118] sm:$0xff]  }
  0x10   :  { %1014 = vmatprep.subr.bf16.mxu0 %v1172_v0  ;;  %1026 = vmatprep.subr.bf16.mxu1 %v1172_v0  ;;  %v1164_v19 = vld [vmem:[%s1455_s1 + $0x130] sm:$0xff]  }
  0x11   :  { %v1165_v20 = vld [vmem:[%s1455_s1 + $0x170] sm:$0xff]  }
  0x12   :  { %999 = vmatmul.mubr.msk.bf16.vlgmr.msra.gmra.mrb[0].mxu0 %vm54_vm1, %v21_v13  ;;  %1011 = vmatmul.mubr.msk.bf16.vlgmr.msra.gmra.mrb[0].mxu1 %vm54_vm1, %v114_v15  ;;  %v1160_v15 = vld [vmem:[%s1455_s1 + $0x120] sm:$0xff]  }
  0x13   :  { %1015 = vmatpush3.bf16.msra.mxu0 %v1132_v14  ;;  %1022 = vmatprep.mubr.msk.bf16.mxu0 %vm1173_vm0, %v1172_v0 }
  0x14   :  { %1016 = vmatprep.subr.bf16.mxu0 %v1172_v0  ;;  %1042 = vmatprep.mubr.msk.bf16.mxu1 %vm1173_vm0, %v1172_v0 }
  0x15   :  { %1027 = vmatpush3.bf16.msra.mxu1 %v1136_v22  ;;  %v1167_v22 = vld [vmem:[%s1455_s1 + $0x178] sm:$0xff]  }
  0x16   :  { %1028 = vmatprep.subr.bf16.mxu1 %v1172_v0 }
  0x17   :  { %1017 = vmatpush3.bf16.msra.mxu0 %v1133_v16  ;;  %v1161_v16 = vld [vmem:[%s1455_s1 + $0x160] sm:$0xff]  }
  0x18   :  { %1018 = vmatprep.subr.bf16.mxu0 %v1172_v0 }
  0x19   :  { %1029 = vmatpush3.bf16.msra.mxu1 %v1138_v24 }
  0x1a   :  { %1030 = vmatprep.subr.bf16.mxu1 %v1172_v0 }
  0x1b   :  { %1019 = vmatpush3.bf16.msra.mxu0 %v1134_v17  ;;  %v1162_v17 = vld [vmem:[%s1455_s1 + $0x128] sm:$0xff]  }
  0x1c   :  { %1020 = vmatprep.subr.bf16.mxu0 %v1172_v0 }
  0x1d   :  { %1031 = vmatpush3.bf16.msra.mxu1 %v1140_v26 }
  0x1e   :  { %1032 = vmatprep.subr.bf16.mxu1 %v1172_v0 }
  0x1f   :  { %1021 = vmatpush3.bf16.msra.mxu0 %v1135_v18  ;;  %v1163_v18 = vld [vmem:[%s1455_s1 + $0x168] sm:$0xff]  }
  0x20   :  { %1046 = vmatprep.subr.bf16.mxu0 %v1172_v0 }
  0x21   :  { %1033 = vmatpush3.bf16.msra.mxu1 %v1142_v28 }
  0x22   :  { %1023 = vmatmul.mubr.msk.bf16.vlgmr.msra.gmra.mrb[4].mxu0 %vm54_vm1, %v197_v21  ;;  %1034 = vmatprep.subr.bf16.mxu1 %v1172_v0  ;;  %v1166_v21 = vld [vmem:[%s1455_s1 + $0x138] sm:$0xff]  }
  0x23   :  { %1062 = vmatprep.mubr.msk.bf16.mxu0 %vm1173_vm0, %v1172_v0  ;;  %1047 = vmatpush3.bf16.msra.mxu0 %v1137_v23 }
  0x24   :  { %1048 = vmatprep.subr.bf16.mxu0 %v1172_v0 }
  0x25   :  { %1035 = vmatpush3.bf16.msra.mxu1 %v1144_v30 }
  0x26   :  { %1036 = vmatprep.subr.bf16.mxu1 %v1172_v0 }
  0x27   :  { %1049 = vmatpush3.bf16.msra.mxu0 %v1139_v25 }
  0x28   :  { %1050 = vmatprep.subr.bf16.mxu0 %v1172_v0 }
  0x29   :  { %1037 = vmatpush3.bf16.msra.mxu1 %v1146_v32 }
  0x2a   :  { %1038 = vmatprep.subr.bf16.mxu1 %v1172_v0 }
  0x2b   :  { %1051 = vmatpush3.bf16.msra.mxu0 %v1141_v27 }
  0x2c   :  { %1052 = vmatprep.subr.bf16.mxu0 %v1172_v0 }
  0x2d   :  { %1039 = vmatpush3.bf16.msra.mxu1 %v1148_v34  ;;  %v916_v34 = vld [vmem:[%s1457_s2 + $0x1] ss:$0 sm:$0xff] }
  0x2e   :  { %1040 = vmatprep.subr.bf16.mxu1 %v1172_v0 }
  0x2f   :  { %1053 = vmatpush3.bf16.msra.mxu0 %v1143_v29 }
  0x30   :  { %1054 = vmatprep.subr.bf16.mxu0 %v1172_v0 }
  0x31   :  { %1041 = vmatpush3.bf16.msra.mxu1 %v1150_v36 }
  0x32   :  { %1066 = vmatprep.subr.bf16.mxu1 %v1172_v0 }
  0x33   :  { %1055 = vmatpush3.bf16.msra.mxu0 %v1145_v31 }
  0x34   :  { %1056 = vmatprep.subr.bf16.mxu0 %v1172_v0 }
  0x37   :  { %1057 = vmatpush3.bf16.msra.mxu0 %v1147_v33 }
  0x38   :  { %1058 = vmatprep.subr.bf16.mxu0 %v1172_v0 }
  0x3b   :  { %1059 = vmatpush3.bf16.msra.mxu0 %v1149_v35 }
  0x3c   :  { %1060 = vmatprep.subr.bf16.mxu0 %v1172_v0 }
  0x3f   :  { %1061 = vmatpush3.bf16.msra.mxu0 %v1151_v37 }
  0x40   :  { %1086 = vmatprep.subr.bf16.mxu0 %v1172_v0 }
  0xe5   :  { %v92_v41 = vpop.f32.mrb[0].mxu0  ;;  %v184_v44 = vpop.f32.mrb[0].mxu1 }
  0xe6   :  { %v108_v42 = vsel %vm102_vm2, 0.0, %v92_v41  ;;  %v1000_v43 = vpop.f32.mrb[1].mxu0  ;;  %v1012_v47 = vpop.f32.mrb[1].mxu1 }
  0xe7   :  { %v191_v45 = vadd.f32 %v184_v44, %v108_v42  ;;  %v95_v46 = vpop.f32.mrb[2].mxu0  ;;  %v187_v50 = vpop.f32.mrb[2].mxu1  ;;  %v1168_v42 = vld [vmem:[%s1455_s1 + $0x140] sm:$0xff]   ;;  %v1169_v47 = vld [vmem:[%s1455_s1 + $0x148] sm:$0xff]  }
  0xe8   :  { %v109_v48 = vsel %vm105_vm3, 0.0, %v95_v46  ;;  %v1001_v49 = vpop.f32.mrb[3].mxu0  ;;  %v1013_v52 = vpop.f32.mrb[3].mxu1 }
  0xe9   :  { %v192_v51 = vadd.f32 %v187_v50, %v109_v48  ;;  %v1170_v48 = vld [vmem:[%s1455_s1 + $0x150] sm:$0xff]   ;;  %v1171_v49 = vld [vmem:[%s1455_s1 + $0x158] sm:$0xff]  }
  0xf5   :  { %v267_v53 = vpop.f32.mrb[4].mxu0 }
  0xf6   :  { %v274_v55 = vadd.f32 %v267_v53, %v191_v45  ;;  %v1024_v56 = vpop.f32.mrb[5].mxu0 }
  0xf7   :  { %v270_v57 = vpop.f32.mrb[6].mxu0 }
  0xf8   :  { %v281_v58 = vadd.f32 %v891_v54, %v274_v55  ;;  %v275_v59 = vadd.f32 %v270_v57, %v192_v51  ;;  %v1025_v60 = vpop.f32.mrb[7].mxu0 }
  0xfa   :  { %v283_v61 = vmax.f32 %v281_v58, 0.0  ;;  %v282_v62 = vadd.f32 %v891_v54, %v275_v59 }
  0xfc   :  { %285 = vst [vmem:[#allocation2 + $0x1] sm:$0xff] %v283_v61  ;;  %v284_v63 = vmax.f32 %v282_v62, 0.0 }
  0xfe   :  { %286 = vst [vmem:[#allocation2 + $0x9] sm:$0xff] %v284_v63  ;;  %v932_v63 = vld [vmem:[%s1457_s2 + $0x2] ss:$0 sm:$0xff] }
 0x105   :  { %v287_v1 = vld [vmem:[#allocation2] ss:$2 sm:$0xff]  ;;  %v397_v2 = vld [vmem:[#allocation2 + $0x1] ss:$2 sm:$0xff] }
 0x106   :  { %v288_v4 = vpack.c.bf16 %v287_v1, %v287_v1  ;;  %v398_v5 = vpack.c.bf16 %v397_v2, %v397_v2  ;;  %v505_v13 = vld [vmem:[#allocation2 + $0x2] ss:$2 sm:$0xff] }
 0x107   :  { %v506_v14 = vpack.c.bf16 %v505_v13, %v505_v13 }
 0x108   :  { %1043 = vmatmul.mubr.bf16.vlgmr.msra.gmra.mrb[4].mxu1 %v288_v4  ;;  %1063 = vmatmul.mubr.bf16.vlgmr.msra.gmra.mrb[8].mxu0 %v398_v5 }
 0x109   :  { %1067 = vmatpush3.bf16.msra.mxu1 %v1152_v3  ;;  %1082 = vmatprep.mubr.msk.bf16.mxu1 %vm1173_vm0, %v1172_v0 }
 0x10a   :  { %1068 = vmatprep.subr.bf16.mxu1 %v1172_v0  ;;  %1094 = vmatprep.mubr.msk.bf16.mxu0 %vm1173_vm0, %v1172_v0 }
 0x10b   :  { %1087 = vmatpush3.bf16.msra.mxu0 %v1160_v15 }
 0x10c   :  { %1088 = vmatprep.subr.bf16.mxu0 %v1172_v0 }
 0x10d   :  { %1069 = vmatpush3.bf16.msra.mxu1 %v1153_v6 }
 0x10e   :  { %1070 = vmatprep.subr.bf16.mxu1 %v1172_v0 }
 0x10f   :  { %1089 = vmatpush3.bf16.msra.mxu0 %v1162_v17 }
 0x110   :  { %1090 = vmatprep.subr.bf16.mxu0 %v1172_v0 }
 0x111   :  { %1071 = vmatpush3.bf16.msra.mxu1 %v1154_v7 }
 0x112   :  { %1072 = vmatprep.subr.bf16.mxu1 %v1172_v0 }
 0x113   :  { %1091 = vmatpush3.bf16.msra.mxu0 %v1164_v19 }
 0x114   :  { %1092 = vmatprep.subr.bf16.mxu0 %v1172_v0 }
 0x115   :  { %1073 = vmatpush3.bf16.msra.mxu1 %v1155_v8 }
 0x116   :  { %1074 = vmatprep.subr.bf16.mxu1 %v1172_v0 }
 0x117   :  { %1093 = vmatpush3.bf16.msra.mxu0 %v1166_v21 }
 0x118   :  { %1098 = vmatprep.subr.bf16.mxu0 %v1172_v0 }
 0x119   :  { %1075 = vmatpush3.bf16.msra.mxu1 %v1156_v9 }
 0x11a   :  { %1076 = vmatprep.subr.bf16.mxu1 %v1172_v0 }
 0x11d   :  { %1077 = vmatpush3.bf16.msra.mxu1 %v1157_v10 }
 0x11e   :  { %1078 = vmatprep.subr.bf16.mxu1 %v1172_v0 }
 0x121   :  { %1079 = vmatpush3.bf16.msra.mxu1 %v1158_v11 }
 0x122   :  { %1080 = vmatprep.subr.bf16.mxu1 %v1172_v0 }
 0x125   :  { %1081 = vmatpush3.bf16.msra.mxu1 %v1159_v12 }
 0x126   :  { %1110 = vmatprep.subr.bf16.mxu1 %v1172_v0 }
 0x128   :  { %1083 = vmatmul.mubr.bf16.vlgmr.msra.gmra.mrb[8].mxu1 %v506_v14 }
 0x129   :  { %1118 = vmatprep.mubr.msk.bf16.mxu1 %vm1173_vm0, %v1172_v0  ;;  %1111 = vmatpush3.bf16.msra.mxu1 %v1161_v16 }
 0x12a   :  { %1112 = vmatprep.subr.bf16.mxu1 %v1172_v0 }
 0x12d   :  { %1113 = vmatpush3.bf16.msra.mxu1 %v1163_v18 }
 0x12e   :  { %1114 = vmatprep.subr.bf16.mxu1 %v1172_v0 }
 0x131   :  { %1115 = vmatpush3.bf16.msra.mxu1 %v1165_v20 }
 0x132   :  { %1116 = vmatprep.subr.bf16.mxu1 %v1172_v0 }
 0x135   :  { %1117 = vmatpush3.bf16.msra.mxu1 %v1167_v22 }
 0x1db   :  { %v387_v23 = vpop.f32.mrb[4].mxu1  ;;  %v497_v24 = vpop.f32.mrb[8].mxu0 }
 0x1dc   :  { %v395_v25 = vsel %vm394_vm6, 0.0, %v387_v23  ;;  %v1044_v26 = vpop.f32.mrb[5].mxu1  ;;  %v1064_v27 = vpop.f32.mrb[9].mxu0 }
 0x1dd   :  { %v503_v28 = vadd.f32 %v497_v24, %v395_v25  ;;  %v390_v29 = vpop.f32.mrb[6].mxu1  ;;  %v500_v30 = vpop.f32.mrb[10].mxu0 }
 0x1de   :  { %v1045_v31 = vpop.f32.mrb[7].mxu1  ;;  %v1065_v32 = vpop.f32.mrb[11].mxu0 }
 0x1fb   :  { %v605_v33 = vpop.f32.mrb[8].mxu1 }
 0x1fc   :  { %v611_v35 = vadd.f32 %v605_v33, %v503_v28  ;;  %v1084_v36 = vpop.f32.mrb[9].mxu1 }
 0x1fd   :  { %v608_v37 = vpop.f32.mrb[10].mxu1 }
 0x1fe   :  { %v617_v38 = vadd.f32 %v916_v34, %v611_v35  ;;  %v1085_v40 = vpop.f32.mrb[11].mxu1 }
 0x200   :  { %v618_v41 = vmax.f32 %v617_v38, 0.0 }
 0x202   :  { %619 = vst.msk [vmem:[#allocation3 + $0x1] sm:$0xff] %vm54_vm1, %v618_v41 }
 0x209   :  { %v620_v43 = vld [vmem:[#allocation3] ss:$2 sm:$0xf]  ;;  %v701_v50 = vld [vmem:[#allocation3 + $0x1] ss:$2 sm:$0xf] }
 0x20a   :  { %v780_v44 = vld [vmem:[#allocation3 + $0x2] ss:$2 sm:$0xf]  ;;  %v621_v45 = vpack.c.bf16 %v620_v43, %v620_v43  ;;  %v702_v51 = vpack.c.bf16 %v701_v50, %v701_v50 }
 0x20b   :  { %v781_v46 = vpack.c.bf16 %v780_v44, %v780_v44 }
 0x20c   :  { %1095 = vmatmul.mubr.msk.bf16.vlgmr.msra.gmra.mrb[12].mxu0 %vm54_vm1, %v621_v45 }
 0x20d   :  { %1119 = vmatmul.mubr.msk.bf16.vlgmr.msra.gmra.mrb[12].mxu1 %vm54_vm1, %v781_v46  ;;  %1099 = vmatpush3.bf16.msra.mxu0 %v1168_v42 }
 0x20e   :  { %1106 = vmatprep.mubr.msk.bf16.mxu0 %vm1173_vm0, %v1172_v0  ;;  %1100 = vmatprep.subr.bf16.mxu0 %v1172_v0 }
 0x211   :  { %1101 = vmatpush3.bf16.msra.mxu0 %v1169_v47 }
 0x212   :  { %1102 = vmatprep.subr.bf16.mxu0 %v1172_v0 }
 0x215   :  { %1103 = vmatpush3.bf16.msra.mxu0 %v1170_v48 }
 0x216   :  { %1104 = vmatprep.subr.bf16.mxu0 %v1172_v0 }
 0x219   :  { %1105 = vmatpush3.bf16.msra.mxu0 %v1171_v49 }
 0x21c   :  { %1107 = vmatmul.mubr.msk.bf16.vlgmr.msra.gmra.mrb[16].mxu0 %vm54_vm1, %v702_v51 }
 0x2df   :  { %v691_v52 = vpop.f32.mrb[12].mxu0 }
 0x2e0   :  { %v851_v53 = vpop.f32.mrb[12].mxu1  ;;  %v1096_v54 = vpop.f32.mrb[13].mxu0  ;;  %v699_v60 = vsel %vm698_vm8, 0.0, %v691_v52 }
 0x2e1   :  { %v1120_v55 = vpop.f32.mrb[13].mxu1  ;;  %v694_v56 = vpop.f32.mrb[14].mxu0 }
 0x2e2   :  { %v854_v57 = vpop.f32.mrb[14].mxu1  ;;  %v1097_v58 = vpop.f32.mrb[15].mxu0 }
 0x2e3   :  { %v1121_v59 = vpop.f32.mrb[15].mxu1 }
 0x2ef   :  { %v772_v0 = vpop.f32.mrb[16].mxu0 }
 0x2f0   :  { %v778_v61 = vadd.f32 %v772_v0, %v699_v60  ;;  %v1108_v62 = vpop.f32.mrb[17].mxu0 }
 0x2f1   :  { %v775_v1 = vpop.f32.mrb[18].mxu0 }
 0x2f2   :  { %v857_v2 = vadd.f32 %v851_v53, %v778_v61  ;;  %v1109_v3 = vpop.f32.mrb[19].mxu0 }
 0x2f4   :  { %v863_v4 = vadd.f32 %v932_v63, %v857_v2 }
 0x2f6   :  { %v864_v5 = vmax.f32 %v863_v4, 0.0 }
 0x2f8   :  { %866 = vst.msk [vmem:[%s1458_s3] sm:$0xf] %vm865_vm9, %v864_v5 }

</bundles_post_ra>
